<compile_context>
chip_gen: v7x
topology: tpu7x:2x2x1
jax: 0.10.0
libtpu: 0.0.40
codegen_flags: <defaults>
</compile_context>

<pallas_src>
import functools

import jax
import jax.numpy as jnp
from jax import lax
from jax.experimental import pallas as pl
from jax.experimental.pallas import tpu as pltpu

EPS = 1e-6  # torch.nn.PairwiseDistance default eps (added to the difference)


def _igdl_kernel(c_ref, g_ref, out_ref, *, p):
    # d = c - g in f32; grad(d) == grad(c) - grad(g) since the stencil is linear.
    d = c_ref[...].astype(jnp.float32) - g_ref[...].astype(jnp.float32)
    _, h, w = d.shape

    col = lax.broadcasted_iota(jnp.int32, d.shape, 2)
    row = lax.broadcasted_iota(jnp.int32, d.shape, 1)

    # x-gradient: gx[b, i, j] = d[b, i, j+1] - d[b, i, j-1], zero padding at borders.
    # pltpu.roll needs non-negative shifts: roll by (w - 1) == roll by -1.
    d_jm1 = jnp.where(col == 0, 0.0, pltpu.roll(d, shift=1, axis=2))        # d[., ., j-1]
    d_jp1 = jnp.where(col == w - 1, 0.0, pltpu.roll(d, shift=w - 1, axis=2))  # d[., ., j+1]
    dx = d_jp1 - d_jm1 + EPS

    # y-gradient: gy[b, i, j] = d[b, i-1, j] - d[b, i+1, j], zero padding at borders.
    d_im1 = jnp.where(row == 0, 0.0, pltpu.roll(d, shift=1, axis=1))        # d[., i-1, .]
    d_ip1 = jnp.where(row == h - 1, 0.0, pltpu.roll(d, shift=h - 1, axis=1))  # d[., i+1, .]
    dy = d_im1 - d_ip1 + EPS

    if p == 1.0:
        # ||v||_1 summed over all rows == plain sum of |v| over the whole block.
        block_sum = jnp.sum(jnp.abs(dx) + jnp.abs(dy))
    elif p == 2.0:
        rx = jnp.sqrt(jnp.sum(dx * dx, axis=2, keepdims=True))
        ry = jnp.sqrt(jnp.sum(dy * dy, axis=2, keepdims=True))
        block_sum = jnp.sum(rx + ry)
    else:
        rx = jnp.sum(jnp.abs(dx) ** p, axis=2, keepdims=True) ** (1.0 / p)
        ry = jnp.sum(jnp.abs(dy) ** p, axis=2, keepdims=True) ** (1.0 / p)
        block_sum = jnp.sum(rx + ry)

    out_ref[...] = jnp.full((1, 1), block_sum, dtype=jnp.float32)


def _choose_block_batch(n, h, w, itemsize, target_bytes=2 * 1024 * 1024):
    """Largest divisor of n whose (tb, h, w) input block is ~target_bytes."""
    per_image = max(1, h * w * itemsize)
    max_tb = max(1, target_bytes // per_image)
    for tb in range(min(n, int(max_tb)), 0, -1):
        if n % tb == 0:
            return tb
    return 1


def igdl_loss(correct_images, generated_images, igdl_p=1.0, *, block_batch=None):
    """correct_images / generated_images: NCHW with C == 1 (see conv weight)."""
    assert correct_images.shape == generated_images.shape
    N, C, H, W = correct_images.shape
    assert C == 1, "conv weight (3,1,3,3) with groups=1 requires 1 input channel"

    # Keep the native dtype for the DMA (bf16 inputs halve HBM traffic);
    # the cast to f32 happens inside the kernel.
    c = correct_images.reshape(N, H, W)
    g = generated_images.reshape(N, H, W)

    if block_batch is None:
        block_batch = _choose_block_batch(N, H, W, jnp.dtype(c.dtype).itemsize)
    assert N % block_batch == 0, "block_batch must divide the batch size"
    num_blocks = N // block_batch

    kernel = functools.partial(_igdl_kernel, p=float(igdl_p))
    partial_sums = pl.pallas_call(
        kernel,
        out_shape=jax.ShapeDtypeStruct((num_blocks, 1), jnp.float32),
        grid_spec=pltpu.PrefetchScalarGridSpec(
            num_scalar_prefetch=0,
            grid=(num_blocks,),
            in_specs=[
                pl.BlockSpec((block_batch, H, W), lambda b: (b, 0, 0)),
                pl.BlockSpec((block_batch, H, W), lambda b: (b, 0, 0)),
            ],
            out_specs=pl.BlockSpec((1, 1), lambda b: (b, 0)),
        ),
        compiler_params=pltpu.CompilerParams(
            # Independent per-block partial sums -> batch axis can be sharded
            # across TensorCores (2 TCs on v7x); no carried accumulator.
            dimension_semantics=("parallel",),
            # Above the 16 MiB v5e scoped default, equal to v6e/v7x defaults,
            # well under physical VMEM on every generation.
            vmem_limit_bytes=32 * 1024 * 1024,
        ),
    )(c, g)

    # mean over (N, 3, H) of identical channels == sum / (N * H)
    return 0.5 * jnp.sum(partial_sums) / jnp.float32(N * H)


def _igdl_loss_ref(c, g, p=1.0):
    """Pure-JAX reference reproducing the PyTorch module (NCHW, C == 1)."""
    c = c.astype(jnp.float32)
    g = g.astype(jnp.float32)

    def gx(x):
        xp = jnp.pad(x, ((0, 0), (0, 0), (0, 0), (1, 1)))
        return xp[..., 2:] - xp[..., :-2]

    def gy(x):
        xp = jnp.pad(x, ((0, 0), (0, 0), (1, 1), (0, 0)))
        return xp[..., :-2, :] - xp[..., 2:, :]

    dx = gx(c) - gx(g) + EPS
    dy = gy(c) - gy(g) + EPS
    distx = jnp.sum(jnp.abs(dx) ** p, axis=-1) ** (1.0 / p)  # norm over W
    disty = jnp.sum(jnp.abs(dy) ** p, axis=-1) ** (1.0 / p)
    return 0.5 * (jnp.mean(distx) + jnp.mean(disty))


if __name__ == "__main__":
    key = jax.random.PRNGKey(0)
    k1, k2, k3, k4 = jax.random.split(key, 4)

    # Primary check: p == 1 (module default), single batch-block.
    N, C, H, W = 2, 1, 16, 16  # C must be 1 (conv weight is (3,1,3,3))
    correct = jax.random.normal(k1, (N, C, H, W), dtype=jnp.float32)
    generated = jax.random.normal(k2, (N, C, H, W), dtype=jnp.float32)

    loss = jax.block_until_ready(igdl_loss(correct, generated, igdl_p=1.0))
    ref = _igdl_loss_ref(correct, generated, p=1.0)
    assert jnp.allclose(loss, ref, rtol=1e-5, atol=1e-5), (loss, ref)

    # Secondary check: p == 2 path and a multi-block "parallel" grid.
    N2, H2, W2 = 6, 8, 8
    correct2 = jax.random.normal(k3, (N2, 1, H2, W2), dtype=jnp.float32)
    generated2 = jax.random.normal(k4, (N2, 1, H2, W2), dtype=jnp.float32)

    loss2 = jax.block_until_ready(
        igdl_loss(correct2, generated2, igdl_p=2.0, block_batch=2)
    )
    ref2 = _igdl_loss_ref(correct2, generated2, p=2.0)
    assert jnp.allclose(loss2, ref2, rtol=1e-5, atol=1e-5), (loss2, ref2)

    print("KERNEL_OK")
</pallas_src>

<mosaic_0001>
module attributes {stable_mosaic.version = 11 : i64} {
  func.func @_igdl_kernel(%arg0: i32, %arg1: memref<2x16x16xf32, #tpu.memory_space<vmem>>, %arg2: memref<2x16x16xf32, #tpu.memory_space<vmem>>, %arg3: memref<1x1xf32, #tpu.memory_space<vmem>>) attributes {dimension_semantics = [#tpu.dimension_semantics<parallel>], iteration_bounds = array<i64: 1>, scalar_prefetch = 0 : i64, scratch_operands = 0 : i64, tpu.core_type = #tpu.core_type<tc>, window_params = [{transform_indices = @transform_0, window_bounds = array<i64: 2, 16, 16>}, {transform_indices = @transform_1, window_bounds = array<i64: 2, 16, 16>}, {transform_indices = @transform_2, window_bounds = array<i64: 1, 1>}]} {
    %c0 = arith.constant 0 : index
    %c0_0 = arith.constant 0 : index
    %c0_1 = arith.constant 0 : index
    %0 = vector.load %arg1[%c0, %c0_0, %c0_1] : memref<2x16x16xf32, #tpu.memory_space<vmem>>, vector<2x16x16xf32>
    %c0_2 = arith.constant 0 : index
    %c0_3 = arith.constant 0 : index
    %c0_4 = arith.constant 0 : index
    %1 = vector.load %arg2[%c0_2, %c0_3, %c0_4] : memref<2x16x16xf32, #tpu.memory_space<vmem>>, vector<2x16x16xf32>
    %2 = arith.subf %0, %1 : vector<2x16x16xf32>
    %3 = tpu.iota {dimensions = array<i32: 2>} : vector<2x16x16xi32>
    %4 = tpu.iota {dimensions = array<i32: 1>} : vector<2x16x16xi32>
    %c0_i32 = arith.constant 0 : i32
    %5 = vector.broadcast %c0_i32 : i32 to vector<2x16x16xi32>
    %6 = arith.cmpi eq, %3, %5 : vector<2x16x16xi32>
    %c1_i32 = arith.constant 1 : i32
    %7 = tpu.dynamic_rotate %2 by %c1_i32 dim 2 : vector<2x16x16xf32>, i32 -> vector<2x16x16xf32>
    %cst = arith.constant 0.000000e+00 : f32
    %8 = vector.broadcast %cst : f32 to vector<2x16x16xf32>
    %9 = arith.select %6, %8, %7 : vector<2x16x16xi1>, vector<2x16x16xf32>
    %c15_i32 = arith.constant 15 : i32
    %10 = vector.broadcast %c15_i32 : i32 to vector<2x16x16xi32>
    %11 = arith.cmpi eq, %3, %10 : vector<2x16x16xi32>
    %c15_i32_5 = arith.constant 15 : i32
    %12 = tpu.dynamic_rotate %2 by %c15_i32_5 dim 2 : vector<2x16x16xf32>, i32 -> vector<2x16x16xf32>
    %cst_6 = arith.constant 0.000000e+00 : f32
    %13 = vector.broadcast %cst_6 : f32 to vector<2x16x16xf32>
    %14 = arith.select %11, %13, %12 : vector<2x16x16xi1>, vector<2x16x16xf32>
    %15 = arith.subf %14, %9 : vector<2x16x16xf32>
    %cst_7 = arith.constant 9.99999997E-7 : f32
    %16 = vector.broadcast %cst_7 : f32 to vector<2x16x16xf32>
    %17 = arith.addf %15, %16 : vector<2x16x16xf32>
    %c0_i32_8 = arith.constant 0 : i32
    %18 = vector.broadcast %c0_i32_8 : i32 to vector<2x16x16xi32>
    %19 = arith.cmpi eq, %4, %18 : vector<2x16x16xi32>
    %c1_i32_9 = arith.constant 1 : i32
    %20 = tpu.dynamic_rotate %2 by %c1_i32_9 dim 1 : vector<2x16x16xf32>, i32 -> vector<2x16x16xf32>
    %cst_10 = arith.constant 0.000000e+00 : f32
    %21 = vector.broadcast %cst_10 : f32 to vector<2x16x16xf32>
    %22 = arith.select %19, %21, %20 : vector<2x16x16xi1>, vector<2x16x16xf32>
    %c15_i32_11 = arith.constant 15 : i32
    %23 = vector.broadcast %c15_i32_11 : i32 to vector<2x16x16xi32>
    %24 = arith.cmpi eq, %4, %23 : vector<2x16x16xi32>
    %c15_i32_12 = arith.constant 15 : i32
    %25 = tpu.dynamic_rotate %2 by %c15_i32_12 dim 1 : vector<2x16x16xf32>, i32 -> vector<2x16x16xf32>
    %cst_13 = arith.constant 0.000000e+00 : f32
    %26 = vector.broadcast %cst_13 : f32 to vector<2x16x16xf32>
    %27 = arith.select %24, %26, %25 : vector<2x16x16xi1>, vector<2x16x16xf32>
    %28 = arith.subf %22, %27 : vector<2x16x16xf32>
    %cst_14 = arith.constant 9.99999997E-7 : f32
    %29 = vector.broadcast %cst_14 : f32 to vector<2x16x16xf32>
    %30 = arith.addf %28, %29 : vector<2x16x16xf32>
    %31 = math.absf %17 : vector<2x16x16xf32>
    %32 = math.absf %30 : vector<2x16x16xf32>
    %33 = arith.addf %31, %32 : vector<2x16x16xf32>
    %34 = vector.shape_cast %33 : vector<2x16x16xf32> to vector<1x2x16x16xf32>
    %cst_15 = arith.constant dense<0.000000e+00> : vector<1xf32>
    %35 = vector.multi_reduction <add>, %34, %cst_15 [1, 2, 3] : vector<1x2x16x16xf32> to vector<1xf32>
    %36 = vector.shape_cast %35 : vector<1xf32> to vector<1x1x1x1xf32>
    %37 = vector.extract %36[0, 0, 0, 0] : f32 from vector<1x1x1x1xf32>
    %38 = vector.broadcast %37 : f32 to vector<1x1xf32>
    %c0_16 = arith.constant 0 : index
    %c0_17 = arith.constant 0 : index
    %39 = vector.load %arg3[%c0_16, %c0_17] : memref<1x1xf32, #tpu.memory_space<vmem>>, vector<1x1xf32>
    tpu.vector_store %arg3[%c0_16, %c0_17], %38 {strides = array<i32>} : memref<1x1xf32, #tpu.memory_space<vmem>>, vector<1x1xf32>,
    return
  }
  func.func @transform_0(%arg0: i32) -> (i32, i32, i32) {
    %c0_i32 = arith.constant 0 : i32
    %c0_i32_0 = arith.constant 0 : i32
    %c0_i32_1 = arith.constant 0 : i32
    return %arg0, %c0_i32, %c0_i32_0 : i32, i32, i32
  }
  func.func @transform_1(%arg0: i32) -> (i32, i32, i32) {
    %c0_i32 = arith.constant 0 : i32
    %c0_i32_0 = arith.constant 0 : i32
    %c0_i32_1 = arith.constant 0 : i32
    return %arg0, %c0_i32, %c0_i32_0 : i32, i32, i32
  }
  func.func @transform_2(%arg0: i32) -> (i32, i32) {
    %c0_i32 = arith.constant 0 : i32
    %c0_i32_0 = arith.constant 0 : i32
    return %arg0, %c0_i32 : i32, i32
  }
}

</mosaic_0001>

<bundles_post_ra>
// kernel: tpu_custom_call.1
= control target key start
LH: loop header
LB: loop body
LE: loop exit
PB: predicated region body
PF: predicated region fallthrough
CT: control target
= control target key end

     0   :  { %7 = vsyncpa [#allocation3], 0  ;;  %s411_s0 = inlined_call_operand.hbm [shape: f32[2,16,16], index: 0, kind: input, shape index: {}]   ;;  %s412_s1 = inlined_call_operand.hbm [shape: f32[2,16,16], index: 1, kind: input, shape index: {}]   ;;  %s413_s2 = inlined_call_operand.hbm [shape: f32[1,1], index: 2, kind: output, shape index: {}]  }
   0x1   :  { %8 = vsyncpa [#allocation6], 0 }
   0x2   :  { %9 = vsyncpa [#allocation4], 0  ;;  %s296_s9 = smov [#allocation2]   ;;  %s224_s13 = scalar_lea.hbm %s411_s0, 512 }
   0x3   :  { %s15_s10 = sshll.u32 %s296_s9, 4  ;;  %p225_p0 = scmp.ne.s32.totalorder %s411_s0, %s224_s13  ;;  %s16_s10 = int_to_ptr.vmem [resolvable:$true] %s15_s10 }
   0x4   :  { %p228_p1 = scmp.lt.u32.totalorder %s224_s13, %s411_s0 }
   0x6   :  { %p230_p2 = pnand %p228_p1, %p225_p0 }
   0x8   :  { %233 = shalt.err (!%p230_p2)
}
   0x9   :  { %s234_s18 = scalar_lea.vmem %s16_s10, 512  ;;  %p239_p4 = scmp.lt.s32.totalorder %s16_s10, %s16_s10 }
   0xa   :  { %p235_p3 = scmp.ne.s32.totalorder %s16_s10, %s234_s18  ;;  %p240_p5 = scmp.lt.s32.totalorder %s234_s18, %s234_s18 }
   0xc   :  { %p241_p6 = por %p240_p5, %p239_p4 }
   0xe   :  { %p242_p7 = pnand %p241_p6, %p235_p3 }
  0x10   :  { %245 = shalt.err (!%p242_p7)
}
  0x11   :  { %s297_s19 = smov 128   ;;  %s298_s20 = smov 8  }
  0x12   :  { %21 = dma.hbm_to_vmem [thread:$0]  %s411_s0, 512, %s16_s10, [#allocation3], %s297_s19, %s297_s19, %s298_s20  }
  0x13   :  { %s299_s23 = smov [#allocation5]   ;;  %s246_s27 = scalar_lea.hbm %s412_s1, 512 }
  0x14   :  { %s27_s24 = sshll.u32 %s299_s23, 4  ;;  %p247_p8 = scmp.ne.s32.totalorder %s412_s1, %s246_s27  ;;  %s28_s24 = int_to_ptr.vmem [resolvable:$true] %s27_s24 }
  0x15   :  { %p250_p9 = scmp.lt.u32.totalorder %s246_s27, %s412_s1 }
  0x17   :  { %p252_p10 = pnand %p250_p9, %p247_p8 }
  0x19   :  { %255 = shalt.err (!%p252_p10)
}
  0x1a   :  { %s256_s4 = scalar_lea.vmem %s28_s24, 512  ;;  %p261_p12 = scmp.lt.s32.totalorder %s28_s24, %s28_s24 }
  0x1b   :  { %p257_p11 = scmp.ne.s32.totalorder %s28_s24, %s256_s4  ;;  %p262_p13 = scmp.lt.s32.totalorder %s256_s4, %s256_s4 }
  0x1d   :  { %p263_p0 = por %p262_p13, %p261_p12 }
  0x1f   :  { %p264_p1 = pnand %p263_p0, %p257_p11 }
  0x21   :  { %267 = shalt.err (!%p264_p1)
}
  0x22   :  { %33 = dma.hbm_to_vmem [thread:$0]  %s412_s1, 512, %s28_s24, [#allocation6], %s297_s19, %s297_s19, %s298_s20  }
  0x23   :  { %290 = dma.done.wait [#allocation3], 512  }
  0x24   :  { %291 = vsyncadd [#allocation3], 4294966784 }
  0x25   :  { %292 = dma.done.wait [#allocation6], 512  }
  0x26   :  { %293 = vsyncadd [#allocation6], 4294966784  ;;  %v40_v0 = vld [vmem:[#allocation2] sm:$0xff]  ;;  %v41_v2 = vld [vmem:[#allocation2 + $0x8] sm:$0xff]  ;;  %s300_s6 = smov 16   ;;  %vm58_vm0 = vcmask 1047680   ;;  %v52_v28 = vlaneseq }
  0x27   :  { %v44_v1 = vld [vmem:[#allocation5] sm:$0xff]  ;;  %v45_v4 = vld [vmem:[#allocation5 + $0x8] sm:$0xff]  ;;  %v42_v5 = vld [vmem:[#allocation2 + $0x10] sm:$0xff]  ;;  %s301_s1 = smov 113   ;;  %s302_s7 = smov 127   ;;  %vm178_vm7 = vcmask 130048  }
  0x28   :  { %v343_v3 = vsub.f32 %v40_v0, %v44_v1  ;;  %v46_v6 = vld [vmem:[#allocation5 + $0x10] sm:$0xff]  ;;  %v43_v8 = vld [vmem:[#allocation2 + $0x18] sm:$0xff]  ;;  %v348_v10 = vsub.f32 %v41_v2, %v45_v4  ;;  %v55_v29 = vshrl.u32 %v52_v28, 7  ;;  %v53_v35 = vand.u32 127, %v52_v28  ;;  %s303_s8 = smov [#allocation7]  }
  0x29   :  { %v345_v7 = vsub.f32 %v42_v5, %v46_v6  ;;  %v47_v9 = vld [vmem:[#allocation5 + $0x18] sm:$0xff]  ;;  %s204_s9 = sshll.u32 %s303_s8, 4  ;;  %vm196_vm8 = vcmask 0   ;;  %s205_s9 = int_to_ptr.vmem [resolvable:$true] %s204_s9 }
  0x2a   :  { %59 = vrot.lane.b32.xlu0 %v343_v3, %s300_s6  ;;  %v351_v11 = vsub.f32 %v43_v8, %v47_v9  ;;  %v56_v30 = vadd.s32 8, %v55_v29  ;;  %v132_v31 = vrot.slane %v348_v10, 7  ;;  %v147_v32 = vrot.slane %v348_v10, 1  ;;  %s268_s11 = scalar_lea.vmem %s205_s9, 16  ;;  %s272_s12 = scalar_lea.vmem %s205_s9, 32 }
  0x2b   :  { %65 = vrot.lane.b32.xlu1 %v345_v7, %s300_s6  ;;  %v130_v33 = vrot.slane %v343_v3, 7  ;;  %v145_v34 = vrot.slane %v343_v3, 1  ;;  %vm134_vm1 = vcmp.lt.s32.totalorder %v55_v29, 1  ;;  %vm149_vm2 = vcmp.lt.s32.totalorder %v55_v29, 7  ;;  %p269_p2 = scmp.ne.s32.totalorder %s205_s9, %s268_s11  ;;  %p273_p3 = scmp.lt.s32.totalorder %s205_s9, %s205_s9 }
  0x2c   :  { %vm144_vm3 = vcmp.eq.s32.totalorder %v56_v30, 15  ;;  %v131_v37 = vrot.slane %v345_v7, 7  ;;  %v133_v38 = vrot.slane %v351_v11, 7  ;;  %vm128_vm4 = vcmp.eq.s32.totalorder %v55_v29, 0  ;;  %p274_p4 = scmp.lt.s32.totalorder %s272_s12, %s268_s11 }
  0x2d   :  { %v152_v36 = vsel %vm149_vm2, %v147_v32, %v145_v34  ;;  %v137_v40 = vsel %vm134_vm1, %v132_v31, %v130_v33  ;;  %v135_v41 = vsel %vm134_vm1, %v130_v33, %v132_v31  ;;  %v146_v43 = vrot.slane %v345_v7, 1 }
  0x2e   :  { %62 = vrot.lane.b32.xlu0 %v348_v10, %s300_s6  ;;  %v155_v42 = vsel %vm144_vm3, 0.0, %v152_v36  ;;  %v148_v44 = vrot.slane %v351_v11, 1  ;;  %vm57_vm5 = vcmp.eq.s32.totalorder %v53_v35, 0  ;;  %vm103_vm6 = vcmp.eq.s32.totalorder %v53_v35, 15  ;;  %p275_p5 = por %p274_p4, %p273_p3 }
  0x2f   :  { %68 = vrot.lane.b32.xlu1 %v351_v11, %s300_s6  ;;  %v138_v45 = vsel %vm134_vm1, %v133_v38, %v131_v37  ;;  %v139_v46 = vsel %vm128_vm4, 0.0, %v137_v40  ;;  %v150_v47 = vsel %vm149_vm2, %v145_v34, %v147_v32  ;;  %v159_v50 = vsub.f32 %v135_v41, %v155_v42 }
  0x30   :  { %v141_v53 = vsel %vm128_vm4, 0.0, %v138_v45  ;;  %v151_v54 = vsel %vm149_vm2, %v146_v43, %v148_v44  ;;  %v158_v56 = vsub.f32 %v139_v46, %v150_v47  ;;  %v153_v57 = vsel %vm149_vm2, %v148_v44, %v146_v43  ;;  %p276_p6 = pnand %p275_p5, %p269_p2 }
  0x31   :  { %v163_v59 = vadd.f32 1e-06, %v159_v50  ;;  %v160_v60 = vsub.f32 %v141_v53, %v151_v54  ;;  %v136_v0 = vsel %vm134_vm1, %v131_v37, %v133_v38  ;;  %v157_v1 = vsel %vm144_vm3, 0.0, %v153_v57 }
  0x33   :  { %v164_v9 = vadd.f32 1e-06, %v160_v60 }
  0x9c   :  { %v60_v12 = vpop.permute.xlu0 %59 }
  0x9d   :  { %v61_v13 = vsel %vm58_vm0, %v60_v12, %v343_v3  ;;  %v66_v14 = vpop.permute.xlu1 %65 }
  0x9e   :  { %71 = vrot.lane.b32.xlu0 %v61_v13, %s300_s6  ;;  %v67_v15 = vsel %vm58_vm0, %v66_v14, %v345_v7 }
  0xa0   :  { %v63_v16 = vpop.permute.xlu0 %62 }
  0xa1   :  { %v64_v17 = vsel %vm58_vm0, %v63_v16, %v348_v10  ;;  %v69_v18 = vpop.permute.xlu1 %68 }
  0xa2   :  { %73 = vrot.lane.b32.xlu1 %v64_v17, %s300_s6  ;;  %75 = vrot.lane.b32.xlu0 %v67_v15, %s300_s6  ;;  %v70_v19 = vsel %vm58_vm0, %v69_v18, %v351_v11 }
  0xa6   :  { %77 = vrot.lane.b32.xlu1 %v70_v19, %s300_s6  ;;  %v172_v19 = vand.u32 2147483647, %v164_v9 }
 0x110   :  { %v72_v20 = vpop.permute.xlu0 %71 }
 0x111   :  { %v79_v21 = vsel %vm58_vm0, %v72_v20, %v343_v3  ;;  %v162_v3 = vadd.f32 1e-06, %v158_v56 }
 0x112   :  { %87 = vrot.lane.b32.xlu0 %v79_v21, %s301_s1 }
 0x113   :  { %v170_v14 = vand.u32 2147483647, %v162_v3 }
 0x114   :  { %v74_v22 = vpop.permute.xlu1 %73  ;;  %v76_v23 = vpop.permute.xlu0 %75 }
 0x115   :  { %v80_v24 = vsel %vm58_vm0, %v74_v22, %v348_v10  ;;  %v81_v25 = vsel %vm58_vm0, %v76_v23, %v345_v7  ;;  %v171_v7 = vand.u32 2147483647, %v163_v59 }
 0x116   :  { %89 = vrot.lane.b32.xlu1 %v80_v24, %s301_s1  ;;  %104 = vrot.lane.b32.xlu0 %v79_v21, %s302_s7 }
 0x118   :  { %v78_v26 = vpop.permute.xlu1 %77 }
 0x119   :  { %v82_v27 = vsel %vm58_vm0, %v78_v26, %v351_v11  ;;  %v161_v11 = vsub.f32 %v136_v0, %v157_v1 }
 0x11a   :  { %106 = vrot.lane.b32.xlu1 %v80_v24, %s302_s7  ;;  %91 = vrot.lane.b32.xlu0 %v81_v25, %s301_s1 }
 0x11b   :  { %v165_v22 = vadd.f32 1e-06, %v161_v11 }
 0x11d   :  { %v173_v29 = vand.u32 2147483647, %v165_v22 }
 0x11e   :  { %108 = vrot.lane.b32.xlu1 %v81_v25, %s302_s7  ;;  %93 = vrot.lane.b32.xlu0 %v82_v27, %s301_s1 }
 0x122   :  { %110 = vrot.lane.b32.xlu1 %v82_v27, %s302_s7 }
 0x184   :  { %v88_v39 = vpop.permute.xlu0 %87 }
 0x185   :  { %v99_v51 = vsel %vm57_vm5, 0.0, %v88_v39 }
 0x188   :  { %v90_v48 = vpop.permute.xlu1 %89  ;;  %v105_v49 = vpop.permute.xlu0 %104 }
 0x189   :  { %v116_v52 = vsel %vm103_vm6, 0.0, %v105_v49  ;;  %v100_v62 = vsel %vm57_vm5, 0.0, %v90_v48 }
 0x18a   :  { %v120_v55 = vsub.f32 %v116_v52, %v99_v51 }
 0x18c   :  { %v107_v58 = vpop.permute.xlu1 %106  ;;  %v92_v61 = vpop.permute.xlu0 %91  ;;  %v124_v2 = vadd.f32 1e-06, %v120_v55 }
 0x18d   :  { %v117_v63 = vsel %vm103_vm6, 0.0, %v107_v58  ;;  %v101_v5 = vsel %vm57_vm5, 0.0, %v92_v61 }
 0x18e   :  { %v121_v4 = vsub.f32 %v117_v63, %v100_v62  ;;  %v166_v13 = vand.u32 2147483647, %v124_v2 }
 0x190   :  { %v125_v6 = vadd.f32 1e-06, %v121_v4  ;;  %v109_v8 = vpop.permute.xlu1 %108  ;;  %v94_v10 = vpop.permute.xlu0 %93  ;;  %v174_v24 = vadd.f32 %v170_v14, %v166_v13 }
 0x191   :  { %v118_v12 = vsel %vm103_vm6, 0.0, %v109_v8  ;;  %v102_v17 = vsel %vm57_vm5, 0.0, %v94_v10 }
 0x192   :  { %v167_v15 = vand.u32 2147483647, %v125_v6  ;;  %v122_v16 = vsub.f32 %v118_v12, %v101_v5  ;;  %v179_v32 = vsel %vm178_vm7, %v174_v24, 0.0 }
 0x194   :  { %v175_v18 = vadd.f32 %v171_v7, %v167_v15  ;;  %v126_v20 = vadd.f32 1e-06, %v122_v16  ;;  %v111_v21 = vpop.permute.xlu1 %110 }
 0x195   :  { %v119_v23 = vsel %vm103_vm6, 0.0, %v111_v21 }
 0x196   :  { %v168_v25 = vand.u32 2147483647, %v126_v20  ;;  %v123_v26 = vsub.f32 %v119_v23, %v102_v17  ;;  %v180_v30 = vsel %vm178_vm7, %v175_v18, 0.0 }
 0x197   :  { %v181_v34 = vadd.f32 %v180_v30, %v179_v32 }
 0x198   :  { %v176_v27 = vadd.f32 %v172_v19, %v168_v25  ;;  %v127_v28 = vadd.f32 1e-06, %v123_v26 }
 0x19a   :  { %v169_v31 = vand.u32 2147483647, %v127_v28  ;;  %v182_v33 = vsel %vm178_vm7, %v176_v27, 0.0 }
 0x19b   :  { %v183_v37 = vadd.f32 %v182_v33, %v181_v34 }
 0x19c   :  { %v177_v36 = vadd.f32 %v173_v29, %v169_v31 }
 0x19e   :  { %v184_v38 = vsel %vm178_vm7, %v177_v36, 0.0 }
 0x19f   :  { %v185_v39 = vadd.f32 %v184_v38, %v183_v37 }
 0x1a1   :  { %186 = vadd.xlane.f32.xlu0 %v185_v39 }
 0x22e   :  { %v187_v40 = vpop.xlane.xlu0 %186 }
 0x22f   :  { %v188_v35 = vrot.slane %v187_v40, 4 }
 0x231   :  { %v189_v41 = vadd.f32 %v188_v35, %v187_v40 }
 0x233   :  { %v190_v42 = vrot.slane %v189_v41, 2 }
 0x235   :  { %v191_v43 = vadd.f32 %v190_v42, %v189_v41 }
 0x237   :  { %v192_v44 = vrot.slane %v191_v43, 1 }
 0x239   :  { %v193_v45 = vadd.f32 %v192_v44, %v191_v43 }
 0x23b   :  { %214 = vpush %v193_v45 }
 0x26c   :  { %s215_s10 = spop %214 }
 0x26d   :  { %v195_v46 = vstv %s215_s10 }
 0x26e   :  { %197 = vst.msk [vmem:[#allocation7] sm:$0x1] %vm196_vm8, %v195_v46 }
 0x26f   :  { %279 = shalt.err (!%p276_p6)
}
 0x270   :  { %s280_s15 = scalar_lea.hbm %s413_s2, 16 }
 0x271   :  { %p281_p7 = scmp.ne.s32.totalorder %s413_s2, %s280_s15  ;;  %p284_p8 = scmp.lt.u32.totalorder %s280_s15, %s413_s2 }
 0x273   :  { %p286_p9 = pnand %p284_p8, %p281_p7 }
 0x275   :  { %289 = shalt.err (!%p286_p9)
}
 0x276   :  { %207 = dma.vmem_to_hbm [thread:$0]  %s205_s9, 16, %s413_s2, [#allocation4]  }
 0x277   :  { %294 = dma.done.wait [#allocation4], 16  }
 0x278   :  { %295 = vsyncadd [#allocation4], 4294967280 }
 0x279   :  { %211 = vsyncpa [#allocation3], 1 }
 0x27a   :  { %212 = vsyncpa [#allocation6], 1 }
 0x27b   :  { %213 = vsyncpa [#allocation4], 1 }

</bundles_post_ra>
